<compile_context>
chip_gen: v7x
topology: tpu7x:2x2x1
jax: 0.10.0
libtpu: 0.0.40
codegen_flags: <defaults>
</compile_context>

<pallas_src>
import functools

import jax
import jax.numpy as jnp
from jax.experimental import pallas as pl
from jax.experimental.pallas import tpu as pltpu

NEG_SLOPE = 0.01  # F.leaky_relu default negative_slope
_MIB = 1024 * 1024


# ----------------------------------------------------------------------------
# Tiling / hardware helpers (static Python ints only)
# ----------------------------------------------------------------------------
def _cdiv(a, b):
    return (a + b - 1) // b


def _round_up(x, m):
    return _cdiv(x, m) * m


def _balanced_tile(dim, align, cap):
    """Split `dim` into the fewest cap-bounded tiles, then equalize the (aligned)
    tile size so padding is minimal. e.g. dim=700, cap=512 -> 2 tiles of 384
    (Kp=768) instead of one full 512 tile + one mostly-dead 512 tile (Kp=1024)."""
    n = max(1, _cdiv(dim, cap))
    return _round_up(_cdiv(dim, n), align)


def _hw_config():
    """Generation-aware tile caps and VMEM budget."""
    vmem_bytes = 64 * _MIB
    try:
        vmem_bytes = int(pltpu.get_tpu_info().vmem_capacity_bytes)
    except Exception:
        pass
    if vmem_bytes >= 100 * _MIB:
        # v5e / v6e: 128 MiB physical VMEM, single TensorCore -> big resident
        # tiles cut weight re-reads and x re-reads.
        return dict(tm_cap=512, tn_cap=1024, tk_cap=1024,
                    vmem_limit=96 * _MIB, multi_core=False)
    # v7x (64 MiB physical VMEM, 2 TensorCores) or unknown -> conservative caps.
    return dict(tm_cap=512, tn_cap=512, tk_cap=512,
                vmem_limit=40 * _MIB, multi_core=True)


def _nk_geometry(din, dout, hw):
    """Batch-independent N/K tile geometry (what the packed weights depend on)."""
    tn = _balanced_tile(dout, 128, hw["tn_cap"])
    if hw["multi_core"] and dout >= 256 and _cdiv(dout, tn) == 1:
        # Ensure >=2 grid steps along N so v7x's two TensorCores both get work
        # even when the whole batch fits in a single M tile.
        lane_blocks = _round_up(dout, 128) // 128
        tn = 128 * max(1, lane_blocks // 2)
    tk = _balanced_tile(din, 128, hw["tk_cap"])
    return tn, tk, _round_up(dout, tn), _round_up(din, tk)


# ----------------------------------------------------------------------------
# One-time weight packing (hoisted out of the per-call wrapper)
# ----------------------------------------------------------------------------
def pack_skip_linear_params(params, compute_dtype=None):
    """Pack SkipLinear weights for the Pallas kernel.  Call ONCE at param-init /
    checkpoint-load time, not per forward call.

    params: {'w1': (out, in), 'b1': (out,)} plus optional {'w2', 'b2'} when the
            shortcut is a Linear (input_size != output_size).
    compute_dtype: optional MXU operand dtype (e.g. jnp.bfloat16); biases and
            accumulation stay float32 regardless.
    """
    w1 = jnp.asarray(params["w1"])
    b1 = jnp.asarray(params["b1"])
    dout, din = w1.shape
    cdtype = jnp.dtype(compute_dtype) if compute_dtype is not None else w1.dtype
    hw = _hw_config()
    tn, tk, np_, kp = _nk_geometry(din, dout, hw)
    n_n = np_ // tn

    def pad_wt(w):  # (out, in) -> zero-padded, transposed (Kp, Np)
        return jnp.pad(jnp.transpose(w),
                       ((0, kp - din), (0, np_ - dout))).astype(cdtype)

    def pad_b(b):   # (out,) -> zero-padded f32 (Np,)
        return jnp.pad(b.astype(jnp.float32), (0, np_ - dout))

    packed = dict(din=din, dout=dout, tn=tn, tk=tk, np=np_, kp=kp,
                  compute_dtype=cdtype, hw=hw, has_proj="w2" in params)

    if "w2" in params:
        w1t, w2t = pad_wt(w1), pad_wt(jnp.asarray(params["w2"]))
        b1f, b2f = pad_b(b1), pad_b(jnp.asarray(params["b2"]))
        # Fuse per N tile: cols [j*2tn, j*2tn+tn) = W1^T tile j,
        #                  cols [j*2tn+tn, (j+1)*2tn) = W2^T tile j,
        # so each grid step issues ONE MXU matmul feeding both branches.
        packed["wf"] = jnp.concatenate(
            [w1t.reshape(kp, n_n, tn), w2t.reshape(kp, n_n, tn)], axis=2
        ).reshape(kp, 2 * np_)
        packed["bf"] = jnp.concatenate(
            [b1f.reshape(n_n, tn), b2f.reshape(n_n, tn)], axis=1
        ).reshape(1, 2 * np_)
    else:
        packed["w1t"] = pad_wt(w1)
        packed["b1f"] = pad_b(b1).reshape(1, np_)
    return packed


# ----------------------------------------------------------------------------
# Kernels
# ----------------------------------------------------------------------------
def _proj_kernel(x_ref, wf_ref, bf_ref, o_ref, *acc, tn, nk):
    """SkipLinear with a Linear shortcut.  wf/bf are [W1^T | W2^T] / [b1 | b2]
    fused per N tile, so one MXU matmul feeds both branches."""

    def epilogue(acc32):
        a = acc32 + bf_ref[...]            # f32 bias, added exactly once
        h = a[:, :tn]                      # main branch:  x @ W1^T + b1
        s = a[:, tn:]                      # shortcut:     x @ W2^T + b2
        h = jnp.where(h > 0, h, NEG_SLOPE * h)
        o_ref[...] = (h + s).astype(o_ref.dtype)

    prod = jnp.dot(x_ref[...], wf_ref[...], preferred_element_type=jnp.float32)

    if nk == 1:                            # single K tile: no scratch, no pl.when
        epilogue(prod)
        return

    acc_ref, = acc
    k = pl.program_id(2)

    @pl.when(k == 0)
    def _():
        acc_ref[...] = prod                # direct write, no zero-fill + add

    @pl.when(k > 0)
    def _():
        acc_ref[...] += prod

    @pl.when(k == nk - 1)
    def _():
        epilogue(acc_ref[...])


def _identity_kernel(x_ref, w1t_ref, b1_ref, xs_ref, o_ref, *acc, nk):
    """SkipLinear with Identity shortcut.  xs_ref is x tiled over the output
    (N) axis; its block index is k-invariant so the pipeline fetches it once."""

    def epilogue(acc32):
        h = acc32 + b1_ref[...]
        h = jnp.where(h > 0, h, NEG_SLOPE * h)
        o_ref[...] = (h + xs_ref[...].astype(jnp.float32)).astype(o_ref.dtype)

    prod = jnp.dot(x_ref[...], w1t_ref[...], preferred_element_type=jnp.float32)

    if nk == 1:
        epilogue(prod)
        return

    acc_ref, = acc
    k = pl.program_id(2)

    @pl.when(k == 0)
    def _():
        acc_ref[...] = prod

    @pl.when(k > 0)
    def _():
        acc_ref[...] += prod

    @pl.when(k == nk - 1)
    def _():
        epilogue(acc_ref[...])


# ----------------------------------------------------------------------------
# Wrapper
# ----------------------------------------------------------------------------
def _weight_spec(block_shape, index_map, deep):
    """Weight BlockSpec; triple-buffered when the grid is deep enough so exposed
    weight-DMA latency is hidden in the small-M / weight-streaming regime."""
    if deep:
        try:
            return pl.BlockSpec(block_shape, index_map,
                                pipeline_mode=pl.Buffered(3))
        except (TypeError, AttributeError):
            pass
    return pl.BlockSpec(block_shape, index_map)


def skip_linear(x, packed):
    """y = leaky_relu(x @ W1^T + b1) + shortcut(x), from pre-packed params."""
    B, din = x.shape
    assert din == packed["din"], "x feature dim does not match packed params"
    dout = packed["dout"]
    tn, tk = packed["tn"], packed["tk"]
    np_, kp = packed["np"], packed["kp"]
    cdtype = packed["compute_dtype"]
    hw = packed["hw"]
    out_dtype = x.dtype

    # Call-time (batch-dependent) M geometry; dtype-aware sublane alignment.
    m_align = max(8, 32 // jnp.dtype(cdtype).itemsize)
    tm = _balanced_tile(B, m_align, hw["tm_cap"])
    n_m, n_n, n_k = _cdiv(B, tm), np_ // tn, kp // tk
    if hw["multi_core"] and n_m * n_n == 1 and B > m_align:
        tm = _round_up(_cdiv(B, 2), m_align)   # give the 2nd TensorCore work
        n_m = _cdiv(B, tm)
    bp = n_m * tm

    x_k = jnp.pad(x, ((0, bp - B), (0, kp - din))).astype(cdtype)

    compiler_params = pltpu.CompilerParams(
        dimension_semantics=("parallel", "parallel", "arbitrary"),
        vmem_limit_bytes=hw["vmem_limit"],
    )
    deep_weights = n_n * n_k >= 3
    grid = (n_m, n_n, n_k)
    out_shape = jax.ShapeDtypeStruct((bp, np_), out_dtype)
    itemsize = jnp.dtype(cdtype).itemsize
    out_bytes = B * dout * jnp.dtype(out_dtype).itemsize

    if packed["has_proj"]:
        wf, bf = packed["wf"], packed["bf"]
        cost = pl.CostEstimate(
            flops=2 * B * din * 2 * dout,
            transcendentals=0,
            bytes_accessed=(x.size + wf.size) * itemsize + bf.size * 4 + out_bytes,
        )
        out_p = pl.pallas_call(
            functools.partial(_proj_kernel, tn=tn, nk=n_k),
            out_shape=out_shape,
            grid_spec=pltpu.PrefetchScalarGridSpec(
                num_scalar_prefetch=0,
                grid=grid,
                in_specs=[
                    pl.BlockSpec((tm, tk), lambda i, j, k: (i, k)),
                    _weight_spec((tk, 2 * tn), lambda i, j, k: (k, j), deep_weights),
                    pl.BlockSpec((1, 2 * tn), lambda i, j, k: (0, j)),
                ],
                out_specs=pl.BlockSpec((tm, tn), lambda i, j, k: (i, j)),
                scratch_shapes=([pltpu.VMEM((tm, 2 * tn), jnp.float32)]
                                if n_k > 1 else []),
            ),
            compiler_params=compiler_params,
            cost_estimate=cost,
        )(x_k, wf, bf)
    else:
        w1t, b1f = packed["w1t"], packed["b1f"]
        # Residual input, tiled over the output axis; kept in x.dtype so the
        # residual add is exact.
        x_n = jnp.pad(x, ((0, bp - B), (0, np_ - dout)))
        cost = pl.CostEstimate(
            flops=2 * B * din * dout,
            transcendentals=0,
            bytes_accessed=(x.size + w1t.size) * itemsize + b1f.size * 4
                           + x.size * x.dtype.itemsize + out_bytes,
        )
        out_p = pl.pallas_call(
            functools.partial(_identity_kernel, nk=n_k),
            out_shape=out_shape,
            grid_spec=pltpu.PrefetchScalarGridSpec(
                num_scalar_prefetch=0,
                grid=grid,
                in_specs=[
                    pl.BlockSpec((tm, tk), lambda i, j, k: (i, k)),
                    _weight_spec((tk, tn), lambda i, j, k: (k, j), deep_weights),
                    pl.BlockSpec((1, tn), lambda i, j, k: (0, j)),
                    pl.BlockSpec((tm, tn), lambda i, j, k: (i, j)),
                ],
                out_specs=pl.BlockSpec((tm, tn), lambda i, j, k: (i, j)),
                scratch_shapes=([pltpu.VMEM((tm, tn), jnp.float32)]
                                if n_k > 1 else []),
            ),
            compiler_params=compiler_params,
            cost_estimate=cost,
        )(x_k, w1t, b1f, x_n)

    return out_p[:B, :dout]


# ----------------------------------------------------------------------------
# Reference / init / tests
# ----------------------------------------------------------------------------
def _init_linear_params(key, in_features, out_features):
    """Deterministic init matching nn.Linear's U(-1/sqrt(in), 1/sqrt(in)) bound."""
    kw, kb = jax.random.split(key)
    bound = 1.0 / jnp.sqrt(jnp.float32(in_features))
    w = jax.random.uniform(kw, (out_features, in_features), jnp.float32, -bound, bound)
    b = jax.random.uniform(kb, (out_features,), jnp.float32, -bound, bound)
    return w, b


def _ref_skip_linear(x, params):
    """Pure-JAX reference for correctness check."""
    h = x @ params["w1"].T + params["b1"]
    h = jnp.where(h > 0, h, NEG_SLOPE * h)
    s = (x @ params["w2"].T + params["b2"]) if "w2" in params else x
    return h + s


if __name__ == "__main__":
    key = jax.random.PRNGKey(0)
    ks = jax.random.split(key, 10)

    # Case 1: input_size != output_size -> Linear shortcut (fused weights),
    # small shapes, single-K-tile fast path (no accumulator scratch).
    B, Din, Dout = 8, 32, 64
    x = jax.random.normal(ks[0], (B, Din), jnp.float32)
    w1, b1 = _init_linear_params(ks[1], Din, Dout)
    w2, b2 = _init_linear_params(ks[2], Din, Dout)
    params_proj = {"w1": w1, "b1": b1, "w2": w2, "b2": b2}
    packed_proj = pack_skip_linear_params(params_proj)   # packed once, reused
    y = jax.block_until_ready(skip_linear(x, packed_proj))
    assert y.shape == (B, Dout)
    assert jnp.allclose(y, _ref_skip_linear(x, params_proj), atol=1e-4, rtol=1e-4)

    # Case 2: input_size == output_size -> Identity shortcut.
    D = 32
    x2 = jax.random.normal(ks[3], (B, D), jnp.float32)
    w1i, b1i = _init_linear_params(ks[4], D, D)
    params_id = {"w1": w1i, "b1": b1i}
    packed_id = pack_skip_linear_params(params_id)
    y2 = jax.block_until_ready(skip_linear(x2, packed_id))
    assert y2.shape == (B, D)
    assert jnp.allclose(y2, _ref_skip_linear(x2, params_id), atol=1e-4, rtol=1e-4)

    # Case 3: unaligned shapes -> exercises balanced-tile padding (Bp=304,
    # Kp=768 instead of 512/1024) and, on 2-TC parts, the forced N split.
    B3, Din3, Dout3 = 300, 700, 260
    x3 = jax.random.normal(ks[5], (B3, Din3), jnp.float32)
    w13, b13 = _init_linear_params(ks[6], Din3, Dout3)
    w23, b23 = _init_linear_params(ks[7], Din3, Dout3)
    params3 = {"w1": w13, "b1": b13, "w2": w23, "b2": b23}
    packed3 = pack_skip_linear_params(params3)
    y3 = jax.block_until_ready(skip_linear(x3, packed3))
    assert y3.shape == (B3, Dout3)
    assert jnp.allclose(y3, _ref_skip_linear(x3, params3), atol=1e-3, rtol=1e-3)

    # Case 4: Identity shortcut with a contraction dim large enough to force
    # nK >= 2 on every TPU generation (exercises the k==0 / k==last accumulator
    # path and the triple-buffered weight stream).
    B4, D4 = 64, 1400
    x4 = jax.random.normal(ks[8], (B4, D4), jnp.float32)
    w14, b14 = _init_linear_params(ks[9], D4, D4)
    params4 = {"w1": w14, "b1": b14}
    packed4 = pack_skip_linear_params(params4)
    y4 = jax.block_until_ready(skip_linear(x4, packed4))
    assert y4.shape == (B4, D4)
    assert jnp.allclose(y4, _ref_skip_linear(x4, params4), atol=2e-3, rtol=2e-3)

    print("KERNEL_OK")
</pallas_src>

<mosaic_0001>
module attributes {stable_mosaic.version = 11 : i64} {
  func.func @_proj_kernel(%arg0: i32, %arg1: i32, %arg2: i32, %arg3: memref<8x128xf32, #tpu.memory_space<vmem>>, %arg4: memref<128x256xf32, #tpu.memory_space<vmem>>, %arg5: memref<1x256xf32, #tpu.memory_space<vmem>>, %arg6: memref<8x128xf32, #tpu.memory_space<vmem>>) attributes {dimension_semantics = [#tpu.dimension_semantics<parallel>, #tpu.dimension_semantics<parallel>, #tpu.dimension_semantics<arbitrary>], iteration_bounds = array<i64: 1, 1, 1>, scalar_prefetch = 0 : i64, scratch_operands = 0 : i64, tpu.core_type = #tpu.core_type<tc>, window_params = [{transform_indices = @transform_0, window_bounds = array<i64: 8, 128>}, {transform_indices = @transform_1, window_bounds = array<i64: 128, 256>}, {transform_indices = @transform_2, window_bounds = array<i64: 1, 256>}, {transform_indices = @transform_3, window_bounds = array<i64: 8, 128>}]} {
    %c0 = arith.constant 0 : index
    %c0_0 = arith.constant 0 : index
    %0 = vector.load %arg3[%c0, %c0_0] : memref<8x128xf32, #tpu.memory_space<vmem>>, vector<8x128xf32>
    %c0_1 = arith.constant 0 : index
    %c0_2 = arith.constant 0 : index
    %1 = vector.load %arg4[%c0_1, %c0_2] : memref<128x256xf32, #tpu.memory_space<vmem>>, vector<128x256xf32>
    %cst = arith.constant dense<0.000000e+00> : vector<8x256xf32>
    %2 = tpu.matmul %0, %1, %cst {dimension_numbers = #tpu.dot_dimension_numbers<[1], [0], [0], [1], [0, 0, 1, 1], [], []>} : vector<8x128xf32>, vector<128x256xf32>, vector<8x256xf32> -> vector<8x256xf32>
    %c0_3 = arith.constant 0 : index
    %c0_4 = arith.constant 0 : index
    %3 = vector.load %arg5[%c0_3, %c0_4] : memref<1x256xf32, #tpu.memory_space<vmem>>, vector<1x256xf32>
    %4 = vector.broadcast %3 : vector<1x256xf32> to vector<8x256xf32>
    %5 = arith.addf %2, %4 : vector<8x256xf32>
    %6 = vector.extract_strided_slice %5 {offsets = [0, 0], sizes = [8, 128], strides = [1, 1]} : vector<8x256xf32> to vector<8x128xf32>
    %7 = vector.extract_strided_slice %5 {offsets = [0, 128], sizes = [8, 128], strides = [1, 1]} : vector<8x256xf32> to vector<8x128xf32>
    %cst_5 = arith.constant 0.000000e+00 : f32
    %8 = vector.broadcast %cst_5 : f32 to vector<8x128xf32>
    %9 = arith.cmpf ogt, %6, %8 : vector<8x128xf32>
    %cst_6 = arith.constant 0.00999999977 : f32
    %10 = vector.broadcast %cst_6 : f32 to vector<8x128xf32>
    %11 = arith.mulf %10, %6 : vector<8x128xf32>
    %12 = arith.select %9, %6, %11 : vector<8x128xi1>, vector<8x128xf32>
    %13 = arith.addf %12, %7 : vector<8x128xf32>
    %c0_7 = arith.constant 0 : index
    %c0_8 = arith.constant 0 : index
    %14 = vector.load %arg6[%c0_7, %c0_8] : memref<8x128xf32, #tpu.memory_space<vmem>>, vector<8x128xf32>
    tpu.vector_store %arg6[%c0_7, %c0_8], %13 {strides = array<i32>} : memref<8x128xf32, #tpu.memory_space<vmem>>, vector<8x128xf32>,
    return
  }
  func.func @transform_0(%arg0: i32, %arg1: i32, %arg2: i32) -> (i32, i32) {
    %c0_i32 = arith.constant 0 : i32
    return %arg0, %arg2 : i32, i32
  }
  func.func @transform_1(%arg0: i32, %arg1: i32, %arg2: i32) -> (i32, i32) {
    %c0_i32 = arith.constant 0 : i32
    return %arg2, %arg1 : i32, i32
  }
  func.func @transform_2(%arg0: i32, %arg1: i32, %arg2: i32) -> (i32, i32) {
    %c0_i32 = arith.constant 0 : i32
    %c0_i32_0 = arith.constant 0 : i32
    return %c0_i32, %arg1 : i32, i32
  }
  func.func @transform_3(%arg0: i32, %arg1: i32, %arg2: i32) -> (i32, i32) {
    %c0_i32 = arith.constant 0 : i32
    return %arg0, %arg1 : i32, i32
  }
}

</mosaic_0001>

<bundles_post_ra>
// kernel: tpu_custom_call.1
= control target key start
LH: loop header
LB: loop body
LE: loop exit
PB: predicated region body
PF: predicated region fallthrough
CT: control target
= control target key end

     0   :  { %8 = vsyncpa [#allocation3], 0  ;;  %s360_s0 = inlined_call_operand.hbm [shape: f32[8,128], index: 0, kind: input, shape index: {}]   ;;  %s361_s1 = inlined_call_operand.hbm [shape: f32[128,256], index: 1, kind: input, shape index: {}]   ;;  %s362_s2 = inlined_call_operand.vmem [shape: f32[1,256], index: 2, kind: input, shape index: {}]   ;;  %s363_s3 = inlined_call_operand.hbm [shape: f32[8,128], index: 3, kind: output, shape index: {}]  }
   0x1   :  { %9 = vsyncpa [#allocation6], 0 }
   0x2   :  { %10 = vsyncpa [#allocation4], 0  ;;  %s288_s12 = smov [#allocation2]   ;;  %s289_s14 = smov [#allocation5]  }
   0x3   :  { %s17_s13 = sshll.u32 %s288_s12, 4  ;;  %s26_s15 = sshll.u32 %s289_s14, 4  ;;  %s18_s13 = int_to_ptr.vmem [resolvable:$true] %s17_s13  ;;  %s314_s15 = int_to_ptr.vmem [resolvable:$true] %s26_s15 }
   0x4   :  { %s216_s18 = scalar_lea.hbm %s360_s0, 128 }
   0x5   :  { %p217_p0 = scmp.ne.s32.totalorder %s360_s0, %s216_s18  ;;  %p220_p1 = scmp.lt.u32.totalorder %s216_s18, %s360_s0 }
   0x7   :  { %p222_p2 = pnand %p220_p1, %p217_p0 }
   0x9   :  { %225 = shalt.err (!%p222_p2)
}
   0xa   :  { %s226_s23 = scalar_lea.vmem %s18_s13, 128  ;;  %p231_p4 = scmp.lt.s32.totalorder %s18_s13, %s18_s13 }
   0xb   :  { %p227_p3 = scmp.ne.s32.totalorder %s18_s13, %s226_s23  ;;  %p232_p5 = scmp.lt.s32.totalorder %s226_s23, %s226_s23 }
   0xd   :  { %p233_p6 = por %p232_p5, %p231_p4 }
   0xf   :  { %p234_p7 = pnand %p233_p6, %p227_p3 }
  0x11   :  { %237 = shalt.err (!%p234_p7)
}
  0x12   :  { %20 = dma.hbm_to_vmem [thread:$0]  %s360_s0, 128, %s18_s13, [#allocation3]  }
  0x13   :  { %s238_s28 = scalar_lea.hbm %s361_s1, 4096 }
  0x14   :  { %p239_p8 = scmp.ne.s32.totalorder %s361_s1, %s238_s28  ;;  %p242_p9 = scmp.lt.u32.totalorder %s238_s28, %s361_s1 }
  0x16   :  { %p244_p10 = pnand %p242_p9, %p239_p8 }
  0x18   :  { %247 = shalt.err (!%p244_p10)
}
  0x19   :  { %s248_s6 = scalar_lea.vmem %s314_s15, 4096  ;;  %p253_p12 = scmp.lt.s32.totalorder %s314_s15, %s314_s15 }
  0x1a   :  { %p249_p11 = scmp.ne.s32.totalorder %s314_s15, %s248_s6  ;;  %p254_p13 = scmp.lt.s32.totalorder %s248_s6, %s248_s6 }
  0x1c   :  { %p255_p0 = por %p254_p13, %p253_p12 }
  0x1e   :  { %p256_p1 = pnand %p255_p0, %p249_p11 }
  0x20   :  { %259 = shalt.err (!%p256_p1)
}
  0x21   :  { %s290_s0 = smov 256   ;;  %s291_s7 = smov 16  }
  0x22   :  { %32 = dma.hbm_to_vmem [thread:$0]  %s361_s1, 4096, %s314_s15, [#allocation6], %s290_s0, %s290_s0, %s291_s7  }
  0x23   :  { %282 = dma.done.wait [#allocation3], 128  }
  0x24   :  { %283 = vsyncadd [#allocation3], 4294967168 }
  0x25   :  { %284 = dma.done.wait [#allocation6], 4096  }
  0x26   :  { %285 = vsyncadd [#allocation6], 4294963200  ;;  %v292_v0 = vmov 0.0   ;;  %v43_v1 = vld [vmem:[#allocation5 + $0x8] sm:$0xff]  ;;  %v45_v2 = vld [vmem:[#allocation5 + $0x18] sm:$0xff]  ;;  %v76_v50 = vlaneseq  ;;  %s293_s11 = smov [#allocation7]  }
  0x27   :  { %150 = vmatprep.mubr.f32.mxu0 %v292_v0  ;;  %v42_v3 = vld [vmem:[#allocation5] sm:$0xff]  ;;  %v178_v4 = vpack.c.bf16 %v45_v2, %v43_v1  ;;  %v44_v5 = vld [vmem:[#allocation5 + $0x10] sm:$0xff]  ;;  %v47_v6 = vld [vmem:[#allocation5 + $0x28] sm:$0xff]  ;;  %s168_s12 = sshll.u32 %s293_s11, 4  ;;  %s169_s12 = int_to_ptr.vmem [resolvable:$true] %s168_s12 }
  0x28   :  { %v49_v7 = vld [vmem:[#allocation5 + $0x38] sm:$0xff]  ;;  %v180_v8 = vpack.c.bf16 %v44_v5, %v42_v3  ;;  %v46_v10 = vld [vmem:[#allocation5 + $0x20] sm:$0xff]  ;;  %v48_v11 = vld [vmem:[#allocation5 + $0x30] sm:$0xff]  ;;  %v77_v51 = vshrl.u32 %v76_v50, 7  ;;  %s260_s13 = scalar_lea.vmem %s169_s12, 128  ;;  %p265_p3 = scmp.lt.s32.totalorder %s169_s12, %s169_s12 }
  0x29   :  { %v182_v9 = vpack.c.bf16 %v49_v7, %v47_v6  ;;  %v51_v12 = vld [vmem:[#allocation5 + $0x48] sm:$0xff]  ;;  %179 = vmatprep.subr.bf16.mxu0 %v178_v4  ;;  %v53_v13 = vld [vmem:[#allocation5 + $0x58] sm:$0xff]  ;;  %v184_v14 = vpack.c.bf16 %v48_v11, %v46_v10  ;;  %v50_v16 = vld [vmem:[#allocation5 + $0x40] sm:$0xff]  ;;  %p261_p2 = scmp.ne.s32.totalorder %s169_s12, %s260_s13  ;;  %p266_p4 = scmp.lt.s32.totalorder %s260_s13, %s260_s13 }
  0x2a   :  { %181 = vmatpush1.bf16.msra.mxu0 %v180_v8  ;;  %v186_v15 = vpack.c.bf16 %v53_v13, %v51_v12  ;;  %v52_v17 = vld [vmem:[#allocation5 + $0x50] sm:$0xff]  ;;  %v55_v18 = vld [vmem:[#allocation5 + $0x68] sm:$0xff]  ;;  %v57_v19 = vld [vmem:[#allocation5 + $0x78] sm:$0xff]  ;;  %v78_v52 = vsub.s32 0, %v77_v51  ;;  %v82_v54 = vsub.s32 1, %v77_v51 }
  0x2b   :  { %183 = vmatprep.subr.bf16.mxu0 %v182_v9  ;;  %v188_v20 = vpack.c.bf16 %v52_v17, %v50_v16  ;;  %v190_v21 = vpack.c.bf16 %v57_v19, %v55_v18  ;;  %v54_v22 = vld [vmem:[#allocation5 + $0x60] sm:$0xff]  ;;  %v56_v23 = vld [vmem:[#allocation5 + $0x70] sm:$0xff]  ;;  %v59_v24 = vld [vmem:[#allocation5 + $0x88] sm:$0xff]  ;;  %p267_p5 = por %p266_p4, %p265_p3 }
  0x2c   :  { %v61_v25 = vld [vmem:[#allocation5 + $0x98] sm:$0xff]  ;;  %v192_v26 = vpack.c.bf16 %v56_v23, %v54_v22  ;;  %v58_v28 = vld [vmem:[#allocation5 + $0x80] sm:$0xff]  ;;  %v60_v29 = vld [vmem:[#allocation5 + $0x90] sm:$0xff] }
  0x2d   :  { %v194_v27 = vpack.c.bf16 %v61_v25, %v59_v24  ;;  %v63_v30 = vld [vmem:[#allocation5 + $0xa8] sm:$0xff]  ;;  %v65_v31 = vld [vmem:[#allocation5 + $0xb8] sm:$0xff]  ;;  %v196_v32 = vpack.c.bf16 %v60_v29, %v58_v28  ;;  %v62_v34 = vld [vmem:[#allocation5 + $0xa0] sm:$0xff]  ;;  %p268_p6 = pnand %p267_p5, %p261_p2 }
  0x2e   :  { %185 = vmatpush1.bf16.msra.mxu0 %v184_v14  ;;  %v198_v33 = vpack.c.bf16 %v65_v31, %v63_v30  ;;  %v64_v35 = vld [vmem:[#allocation5 + $0xb0] sm:$0xff]  ;;  %v67_v36 = vld [vmem:[#allocation5 + $0xc8] sm:$0xff]  ;;  %v69_v37 = vld [vmem:[#allocation5 + $0xd8] sm:$0xff] }
  0x2f   :  { %187 = vmatprep.subr.bf16.mxu0 %v186_v15  ;;  %v200_v38 = vpack.c.bf16 %v64_v35, %v62_v34  ;;  %v202_v39 = vpack.c.bf16 %v69_v37, %v67_v36  ;;  %v66_v40 = vld [vmem:[#allocation5 + $0xc0] sm:$0xff]  ;;  %v68_v41 = vld [vmem:[#allocation5 + $0xd0] sm:$0xff]  ;;  %v71_v42 = vld [vmem:[#allocation5 + $0xe8] sm:$0xff] }
  0x30   :  { %v73_v43 = vld [vmem:[#allocation5 + $0xf8] sm:$0xff]  ;;  %v204_v44 = vpack.c.bf16 %v68_v41, %v66_v40  ;;  %v70_v46 = vld [vmem:[#allocation5 + $0xe0] sm:$0xff]  ;;  %v72_v47 = vld [vmem:[#allocation5 + $0xf0] sm:$0xff] }
  0x31   :  { %v206_v45 = vpack.c.bf16 %v73_v43, %v71_v42  ;;  %v208_v48 = vpack.c.bf16 %v72_v47, %v70_v46  ;;  %v41_v49 = vld [vmem:[#allocation2] sm:$0xff] }
  0x32   :  { %189 = vmatpush1.bf16.msra.mxu0 %v188_v20  ;;  %v74_v53 = vld [vmem:[%s362_s2] sm:$0x3] }
  0x33   :  { %191 = vmatprep.subr.bf16.mxu0 %v190_v21  ;;  %v79_v55 = vrot.slane %v74_v53, %v78_v52  ;;  %v83_v57 = vrot.slane %v74_v53, %v82_v54 }
  0x36   :  { %193 = vmatpush1.bf16.msra.mxu0 %v192_v26 }
  0x37   :  { %195 = vmatprep.subr.bf16.mxu0 %v194_v27 }
  0x3a   :  { %197 = vmatpush1.bf16.msra.mxu0 %v196_v32 }
  0x3b   :  { %199 = vmatprep.subr.bf16.mxu0 %v198_v33 }
  0x3e   :  { %201 = vmatpush1.bf16.msra.mxu0 %v200_v38 }
  0x3f   :  { %203 = vmatprep.subr.bf16.mxu0 %v202_v39 }
  0x42   :  { %205 = vmatpush1.bf16.msra.mxu0 %v204_v44 }
  0x43   :  { %207 = vmatprep.subr.bf16.mxu0 %v206_v45 }
  0x46   :  { %209 = vmatpush1.bf16.msra.mxu0 %v208_v48 }
  0x49   :  { %151 = vmatmul.mubr.f32.vlgmr.msra.gmra.mrb[0].mxu0 %v41_v49 }
 0x11c   :  { %v152_v56 = vpop.f32.mrb[0].mxu0 }
 0x11d   :  { %v153_v58 = vadd.f32 %v152_v56, %v79_v55  ;;  %v154_v59 = vpop.f32.mrb[1].mxu0 }
 0x11e   :  { %v155_v61 = vadd.f32 %v154_v59, %v83_v57 }
 0x11f   :  { %vm157_vm0 = vcmp.gt.f32.partialorder %v153_v58, 0.0  ;;  %v158_v60 = vmul.f32 0.01, %v153_v58 }
 0x121   :  { %v159_v62 = vsel %vm157_vm0, %v153_v58, %v158_v60 }
 0x122   :  { %v160_v63 = vadd.f32 %v159_v62, %v155_v61 }
 0x124   :  { %161 = vst [vmem:[#allocation7] sm:$0xff] %v160_v63 }
 0x125   :  { %271 = shalt.err (!%p268_p6)
}
 0x126   :  { %s272_s15 = scalar_lea.hbm %s363_s3, 128 }
 0x127   :  { %p273_p7 = scmp.ne.s32.totalorder %s363_s3, %s272_s15  ;;  %p276_p8 = scmp.lt.u32.totalorder %s272_s15, %s363_s3 }
 0x129   :  { %p278_p9 = pnand %p276_p8, %p273_p7 }
 0x12b   :  { %281 = shalt.err (!%p278_p9)
}
 0x12c   :  { %171 = dma.vmem_to_hbm [thread:$0]  %s169_s12, 128, %s363_s3, [#allocation4]  }
 0x12d   :  { %286 = dma.done.wait [#allocation4], 128  }
 0x12e   :  { %287 = vsyncadd [#allocation4], 4294967168 }
 0x12f   :  { %175 = vsyncpa [#allocation3], 1 }
 0x130   :  { %176 = vsyncpa [#allocation6], 1 }
 0x131   :  { %177 = vsyncpa [#allocation4], 1 }

</bundles_post_ra>
